<compile_context>
chip_gen: v5e
topology: v5e:2x2
jax: 0.10.0
libtpu: 0.0.40
codegen_flags: <defaults>
</compile_context>

<pallas_src>
import math

import jax
import jax.numpy as jnp
from jax.experimental import pallas as pl
from jax.experimental.pallas import tpu as pltpu

_LANE = 128
_TARGET_TILE_BYTES = 8 * 1024 * 1024   # ~8 MiB per tile
_VMEM_LIMIT_BYTES = 48 * 1024 * 1024   # 32 MiB live (2 dirs x 2 bufs x 8 MiB) + headroom; fits v7x 64 MiB


def _affine_kernel(params_ref, x_ref, o_ref):
    # params_ref lives in SMEM: [scale, shift] (f32).  Scalar loads per tile
    # are free filler in the scalar slot; the body is a pure VPU streaming op.
    scale = params_ref[0]
    shift = params_ref[1]
    x = x_ref[...].astype(jnp.float32)
    o_ref[...] = (x * scale + shift).astype(o_ref.dtype)


@jax.jit
def _affine_pallas(x, params):
    """y = x * params[0] + params[1], elementwise, via a lane-dense Pallas kernel."""
    orig_shape = x.shape
    dtype = x.dtype
    n = x.size
    if n == 0:
        return x

    dsize = jnp.dtype(dtype).itemsize
    sub = max(8, 32 // dsize)            # packed sublane multiple: f32=8, bf16=16, int8=32

    flat = x.reshape(-1)

    # Lane-dense 2D view.  Common path: widest multiple-of-128 lane dim that
    # divides n exactly (metadata-only reshape, no copies).  Ragged path: pad
    # the flat view once to a multiple of (sub*128) so every store stays an
    # unmasked 128-lane-dense vst instead of a masked vst.msk.
    lane = None
    for cand in (4096, 2048, 1024, 512, 256, 128):
        if n % cand == 0:
            lane = cand
            break
    if lane is None:
        lane = _LANE
        n_pad = pl.cdiv(n, sub * lane) * (sub * lane)
        flat = jnp.pad(flat, (0, n_pad - n))
        padded = True
    else:
        n_pad = n
        padded = False
    rows = n_pad // lane
    x2d = flat.reshape(rows, lane)

    # Block shape: ~_TARGET_TILE_BYTES per tile, sublane dim a multiple of the
    # packed tile height.  A whole-array single block can only happen for tiny
    # inputs (rows <= sub => at most lane*sub elements, well under the target),
    # so the "giant block exceeds VMEM" failure mode is gone.
    if rows <= sub:
        block_rows = rows                                    # full-extent sublane dim
    else:
        block_rows = max(sub, _TARGET_TILE_BYTES // (lane * dsize))
        block_rows = (block_rows // sub) * sub
        block_rows = min(block_rows, (rows // sub) * sub)
    grid_rows = pl.cdiv(rows, block_rows)
    if grid_rows > 1 and grid_rows % 2 == 1:
        # Prefer an even step count so 2-TC chips (v7x) get a balanced split.
        block_rows = max(sub, pl.cdiv(pl.cdiv(rows, grid_rows + 1), sub) * sub)
        grid_rows = pl.cdiv(rows, block_rows)

    out2d = pl.pallas_call(
        _affine_kernel,
        out_shape=jax.ShapeDtypeStruct((rows, lane), dtype),
        grid_spec=pltpu.PrefetchScalarGridSpec(
            num_scalar_prefetch=0,
            grid=(grid_rows,),
            in_specs=[
                pl.BlockSpec(memory_space=pltpu.MemorySpace.SMEM),   # [scale, shift]
                pl.BlockSpec((block_rows, lane), lambda i: (i, 0)),
            ],
            out_specs=pl.BlockSpec((block_rows, lane), lambda i: (i, 0)),
        ),
        # TODO(synk): if an xprof trace on v7x shows this 1-D grid pinned to a
        # single TensorCore, switch to pltpu.CORE_PARALLEL here.
        compiler_params=pltpu.CompilerParams(
            dimension_semantics=("parallel",),
            vmem_limit_bytes=_VMEM_LIMIT_BYTES,
        ),
        cost_estimate=pl.CostEstimate(
            flops=2 * n_pad, transcendentals=0, bytes_accessed=2 * n_pad * dsize),
    )(params, x2d)

    out_flat = out2d.reshape(-1)
    if padded:
        out_flat = out_flat[:n]
    return out_flat.reshape(orig_shape)


class Standardizer:
    """Pallas equivalent of the PyTorch Standardizer module (scalar stats)."""

    # TODO(synk): per-channel (tensor-valued) mean/variance would need a
    # broadcast VMEM operand; the reference module uses scalar stats.
    def __init__(self, mean, variance, eta=1e-06, name=None, **kwargs):
        self._mean = float(mean)
        self._variance = float(variance)
        self._sd = math.sqrt(self._variance)
        self._eta = float(eta)
        self.name = name

    def __call__(self, x, normalize=1):
        if normalize == 1:
            # (x - mean) / (sd + eta)  ==  x * scale + shift (folded in f64 here)
            scale = 1.0 / (self._sd + self._eta)
            shift = -self._mean * scale
        else:
            # x * (sd + eta) + mean
            scale = self._sd + self._eta
            shift = self._mean
        params = jnp.array([scale, shift], dtype=jnp.float32)
        return _affine_pallas(x, params)


if __name__ == "__main__":
    key = jax.random.PRNGKey(0)
    mean, variance, eta = 0.5, 4.0, 1e-06
    sd = math.sqrt(variance)
    std = Standardizer(mean=mean, variance=variance, eta=eta)

    # Small NCHW input (lane-dense fast path): batch=2, channels=4, spatial=16x16.
    x = jax.random.normal(key, (2, 4, 16, 16), dtype=jnp.float32)

    # standardize (normalize=1)
    y = jax.block_until_ready(std(x, normalize=1))
    ref_y = (x - mean) / (sd + eta)
    assert y.shape == x.shape, (y.shape, x.shape)
    assert y.dtype == x.dtype, (y.dtype, x.dtype)
    assert bool(jnp.allclose(y, ref_y, rtol=1e-5, atol=1e-5)), "standardize mismatch"

    # destandardize (normalize=0) and round-trip
    z = jax.block_until_ready(std(y, normalize=0))
    ref_z = y * (sd + eta) + mean
    assert bool(jnp.allclose(z, ref_z, rtol=1e-5, atol=1e-5)), "destandardize mismatch"
    assert bool(jnp.allclose(z, x, rtol=1e-4, atol=1e-5)), "round-trip mismatch"

    # Ragged path (size not a multiple of 128): exercises the padded lane-dense branch.
    xr = jax.random.normal(jax.random.PRNGKey(1), (3, 5, 7), dtype=jnp.float32)
    yr = jax.block_until_ready(std(xr, normalize=1))
    ref_yr = (xr - mean) / (sd + eta)
    assert yr.shape == xr.shape, (yr.shape, xr.shape)
    assert bool(jnp.allclose(yr, ref_yr, rtol=1e-5, atol=1e-5)), "ragged standardize mismatch"

    print("KERNEL_OK")
</pallas_src>

<mosaic_0001>
module attributes {stable_mosaic.version = 11 : i64} {
  func.func @_affine_kernel(%arg0: i32, %arg1: memref<2xf32, #tpu.memory_space<smem>>, %arg2: memref<1x2048xf32, #tpu.memory_space<vmem>>, %arg3: memref<1x2048xf32, #tpu.memory_space<vmem>>) attributes {dimension_semantics = [#tpu.dimension_semantics<parallel>], iteration_bounds = array<i64: 1>, scalar_prefetch = 0 : i64, scratch_operands = 0 : i64, tpu.core_type = #tpu.core_type<tc>, window_params = [{transform_indices = @transform_0, window_bounds = array<i64: 2>}, {transform_indices = @transform_1, window_bounds = array<i64: 1, 2048>}, {transform_indices = @transform_2, window_bounds = array<i64: 1, 2048>}]} {
    %c0 = arith.constant 0 : index
    %0 = memref.load %arg1[%c0] : memref<2xf32, #tpu.memory_space<smem>>
    %c1 = arith.constant 1 : index
    %1 = memref.load %arg1[%c1] : memref<2xf32, #tpu.memory_space<smem>>
    %c0_0 = arith.constant 0 : index
    %c0_1 = arith.constant 0 : index
    %2 = vector.load %arg2[%c0_0, %c0_1] : memref<1x2048xf32, #tpu.memory_space<vmem>>, vector<1x2048xf32>
    %3 = vector.broadcast %0 : f32 to vector<1x2048xf32>
    %4 = arith.mulf %2, %3 : vector<1x2048xf32>
    %5 = vector.broadcast %1 : f32 to vector<1x2048xf32>
    %6 = arith.addf %4, %5 : vector<1x2048xf32>
    %c0_2 = arith.constant 0 : index
    %c0_3 = arith.constant 0 : index
    %7 = vector.load %arg3[%c0_2, %c0_3] : memref<1x2048xf32, #tpu.memory_space<vmem>>, vector<1x2048xf32>
    tpu.vector_store %arg3[%c0_2, %c0_3], %6 {strides = array<i32>} : memref<1x2048xf32, #tpu.memory_space<vmem>>, vector<1x2048xf32>,
    return
  }
  func.func @transform_0(%arg0: i32) -> i32 {
    %c0_i32 = arith.constant 0 : i32
    %c0_i32_0 = arith.constant 0 : i32
    return %c0_i32 : i32
  }
  func.func @transform_1(%arg0: i32) -> (i32, i32) {
    %c0_i32 = arith.constant 0 : i32
    %c0_i32_0 = arith.constant 0 : i32
    return %arg0, %c0_i32 : i32, i32
  }
  func.func @transform_2(%arg0: i32) -> (i32, i32) {
    %c0_i32 = arith.constant 0 : i32
    %c0_i32_0 = arith.constant 0 : i32
    return %arg0, %c0_i32 : i32, i32
  }
}

</mosaic_0001>

<bundles_post_ra>
// kernel: _affine_pallas.1
= control target key start
LH: loop header
LB: loop body
LE: loop exit
PB: predicated region body
PF: predicated region fallthrough
CT: control target
= control target key end

     0   :  { %7 = vsyncpa [#allocation3], 0  ;;  %s57_s12 = smov [#allocation2]   ;;  %s88_s0 = inlined_call_operand.vmem [shape: f32[2], index: 0, kind: input, shape index: {}]   ;;  %s89_s1 = inlined_call_operand.vmem [shape: f32[1,2048], index: 1, kind: input, shape index: {}]   ;;  %s90_s2 = inlined_call_operand.vmem [shape: f32[1,2048], index: 2, kind: output, shape index: {}]  }
   0x1   :  { %s13_s11 = sshll.u32 %s88_s0, 4  ;;  %s14_s11 = int_to_ptr.vmem [resolvable:$true] %s13_s11 }
   0x2   :  { %16 = dma.vmem_to_smem %s14_s11, 16, %s57_s12, [#allocation3]  }
   0x3   :  { %55 = dma.done.wait [#allocation3], 16  }
   0x4   :  { %56 = vsyncadd [#allocation3], 4294967280 }
   0x5   :  { %23 = sfence }
   0x6   :  { %s24_s13 = sld [smem:[#allocation2]]  ;;  %v26_v0 = vld [vmem:[%s89_s1] sm:$0xff]  ;;  %v27_v1 = vld [vmem:[%s89_s1 + $0x8] sm:$0xff] }
   0x7   :  { %s41_s14 = sld [smem:[#allocation2 + $0x1]] }
   0xc   :  { %v28_v2 = vstv %s24_s13 }
   0xd   :  { %v29_v3 = vmul.f32 %v28_v2, %v26_v0  ;;  %v31_v4 = vstv %s41_s14  ;;  %v30_v5 = vmul.f32 %v28_v2, %v27_v1 }
   0xf   :  { %v32_v6 = vadd.f32 %v31_v4, %v29_v3  ;;  %v33_v7 = vadd.f32 %v31_v4, %v30_v5 }
  0x11   :  { %34 = vst [vmem:[%s90_s2] sm:$0xff] %v32_v6 }
  0x12   :  { %35 = vst [vmem:[%s90_s2 + $0x8] sm:$0xff] %v33_v7 }
  0x13   :  { %40 = vsyncpa [#allocation3], 1 }

</bundles_post_ra>
